<compile_context>
chip_gen: v7x
topology: tpu7x:2x2x1
jax: 0.10.0
libtpu: 0.0.40
codegen_flags: <defaults>
</compile_context>

<pallas_src>
import jax
import jax.numpy as jnp
from jax.experimental import pallas as pl
from jax.experimental.pallas import tpu as pltpu


def _ordinal_loss_kernel(w_ref, est_ref, gt_ref, out_ref):
    # w_ref  : (1,)        f32  SMEM   (inter_loss_weight)
    # est_ref: (2, S, TN)  f32  VMEM   (channel, segment [sublane], batch [lane])
    # gt_ref : (2, TN)     i32  VMEM   (channel, batch)
    # out_ref: (1,)        f32  SMEM   (scalar loss, resident across the whole grid)
    i = pl.program_id(0)

    @pl.when(i == 0)
    def _init():
        out_ref[0] = jnp.float32(0.0)

    e0 = est_ref[0]            # (S, TN) f32  -- position channel
    e1 = est_ref[1]            # (S, TN) f32  -- orientation channel
    g0 = gt_ref[0:1, :]        # (1, TN) i32
    g1 = gt_ref[1:2, :]        # (1, TN) i32

    S, TN = e0.shape
    seg = jax.lax.broadcasted_iota(jnp.int32, (S, TN), 0)   # segment index on sublanes

    # Cumulative ordinal target fused into the diff: target = 1.0 where seg <= gt else 0.0.
    d0 = jnp.where(seg <= g0, e0 - 1.0, e0)
    d1 = jnp.where(seg <= g1, e1 - 1.0, e1)

    s0 = jnp.sum(d0 * d0)      # scalar partial sum, channel 0
    s1 = jnp.sum(d1 * d1)      # scalar partial sum, channel 1

    w = w_ref[0]
    out_ref[0] += w * s0 + (jnp.float32(1.0) - w) * s1


def camera_pose_ordinal_loss(est_pose_class, gt_labels, inter_loss_weight):
    """Pallas wrapper.

    est_pose_class: (N, S, 2) float, gt_labels: (N, 2) int, inter_loss_weight: scalar.
    Returns the scalar ordinal loss (matches the PyTorch forward).
    """
    N, S, C = est_pose_class.shape
    assert C == 2

    # Layout plumbing in the wrapper (cheap XLA transpose): batch -> lanes, segments -> sublanes.
    est_t = jnp.transpose(est_pose_class.astype(jnp.float32), (2, 1, 0))   # (2, S, N)
    gt_t = jnp.transpose(gt_labels.astype(jnp.int32), (1, 0))              # (2, N)
    w_arr = jnp.reshape(jnp.asarray(inter_loss_weight, dtype=jnp.float32), (1,))

    # Tile the (lane) batch axis: tn must divide N and be a multiple of 128, or tn == N
    # (block == full dim is always legal). 512 lanes keeps the streaming version near the
    # HBM roofline while staying well inside every generation's scoped-VMEM budget.
    tn = N
    if N % 128 == 0:
        tn = min(N, 512)
        while N % tn != 0:
            tn //= 2
    grid_n = N // tn

    out = pl.pallas_call(
        _ordinal_loss_kernel,
        out_shape=jax.ShapeDtypeStruct((1,), jnp.float32),
        grid=(grid_n,),
        in_specs=[
            pl.BlockSpec(memory_space=pltpu.MemorySpace.SMEM),        # weight (1,)
            pl.BlockSpec((2, S, tn), lambda i: (0, 0, i)),            # est   (2, S, N)
            pl.BlockSpec((2, tn), lambda i: (0, i)),                  # gt    (2, N)
        ],
        out_specs=pl.BlockSpec(memory_space=pltpu.MemorySpace.SMEM),  # scalar loss
        compiler_params=pltpu.CompilerParams(
            dimension_semantics=("arbitrary",)),                      # reduction axis
    )(w_arr, est_t, gt_t)
    return out[0]


def _reference_loss(est_pose_class, gt_labels, inter_loss_weight):
    """Pure-JAX reference mirroring the PyTorch forward."""
    N, S, C = est_pose_class.shape
    seg = jnp.arange(S)[None, :, None]                                 # (1, S, 1)
    gt_class = (seg <= gt_labels[:, None, :]).astype(jnp.float32)      # (N, S, 2)
    d2 = (est_pose_class.astype(jnp.float32) - gt_class) ** 2
    per_sample = (inter_loss_weight * d2[:, :, 0].sum(axis=1)
                  + (1.0 - inter_loss_weight) * d2[:, :, 1].sum(axis=1))
    return jnp.sum(per_sample)


if __name__ == "__main__":
    inter_loss_weight = 0.7
    key = jax.random.PRNGKey(0)

    # Small case matching the module's natural shapes (N=2 poses, 8 ordinal segments).
    N, S = 2, 8
    k_est, k_gt0, k_gt1, k_next = jax.random.split(key, 4)
    est_pose_class = jax.random.normal(k_est, (N, S, 2), dtype=jnp.float32)
    gt_labels = jnp.stack(
        [jax.random.randint(k_gt0, (N,), 0, S),
         jax.random.randint(k_gt1, (N,), 0, S)], axis=1).astype(jnp.int32)

    loss = jax.block_until_ready(
        camera_pose_ordinal_loss(est_pose_class, gt_labels, inter_loss_weight))
    ref = _reference_loss(est_pose_class, gt_labels, inter_loss_weight)
    assert jnp.allclose(loss, ref, rtol=1e-5, atol=1e-5), (loss, ref)

    # Larger lane-dense case exercising the streaming (grid > 1) accumulator path.
    N2, S2 = 1024, 16
    k_e2, k_g20, k_g21 = jax.random.split(k_next, 3)
    est2 = jax.random.normal(k_e2, (N2, S2, 2), dtype=jnp.float32)
    gt2 = jnp.stack(
        [jax.random.randint(k_g20, (N2,), 0, S2),
         jax.random.randint(k_g21, (N2,), 0, S2)], axis=1).astype(jnp.int32)

    loss2 = jax.block_until_ready(
        camera_pose_ordinal_loss(est2, gt2, inter_loss_weight))
    ref2 = _reference_loss(est2, gt2, inter_loss_weight)
    assert jnp.allclose(loss2, ref2, rtol=1e-4, atol=1e-4), (loss2, ref2)

    print("KERNEL_OK")
</pallas_src>

<mosaic_0001>
module attributes {stable_mosaic.version = 11 : i64} {
  func.func @_ordinal_loss_kernel(%arg0: i32, %arg1: memref<1xf32, #tpu.memory_space<smem>>, %arg2: memref<2x8x2xf32, #tpu.memory_space<vmem>>, %arg3: memref<2x2xi32, #tpu.memory_space<vmem>>, %arg4: memref<1xf32, #tpu.memory_space<smem>>) attributes {dimension_semantics = [#tpu.dimension_semantics<arbitrary>], iteration_bounds = array<i64: 1>, scalar_prefetch = 0 : i64, scratch_operands = 0 : i64, tpu.core_type = #tpu.core_type<tc>, window_params = [{transform_indices = @transform_0, window_bounds = array<i64: 1>}, {transform_indices = @transform_1, window_bounds = array<i64: 2, 8, 2>}, {transform_indices = @transform_2, window_bounds = array<i64: 2, 2>}, {transform_indices = @transform_3, window_bounds = array<i64: 1>}]} {
    %c0_i32 = arith.constant 0 : i32
    %0 = arith.cmpi eq, %arg0, %c0_i32 : i32
    %1 = arith.extui %0 : i1 to i32
    %c0_i32_0 = arith.constant 0 : i32
    %2 = arith.cmpi ne, %1, %c0_i32_0 : i32
    scf.if %2 {
      %cst_16 = arith.constant 0.000000e+00 : f32
      %c0_17 = arith.constant 0 : index
      %38 = memref.load %arg4[%c0_17] : memref<1xf32, #tpu.memory_space<smem>>
      memref.store %cst_16, %arg4[%c0_17] : memref<1xf32, #tpu.memory_space<smem>>
    } else {
    }
    %c0 = arith.constant 0 : index
    %c0_1 = arith.constant 0 : index
    %c0_2 = arith.constant 0 : index
    %3 = vector.load %arg2[%c0, %c0_1, %c0_2] : memref<2x8x2xf32, #tpu.memory_space<vmem>>, vector<1x8x2xf32>
    %4 = vector.shape_cast %3 : vector<1x8x2xf32> to vector<8x2xf32>
    %c1 = arith.constant 1 : index
    %c0_3 = arith.constant 0 : index
    %c0_4 = arith.constant 0 : index
    %5 = vector.load %arg2[%c1, %c0_3, %c0_4] : memref<2x8x2xf32, #tpu.memory_space<vmem>>, vector<1x8x2xf32>
    %6 = vector.shape_cast %5 : vector<1x8x2xf32> to vector<8x2xf32>
    %c0_5 = arith.constant 0 : index
    %c0_6 = arith.constant 0 : index
    %7 = vector.load %arg3[%c0_5, %c0_6] : memref<2x2xi32, #tpu.memory_space<vmem>>, vector<1x2xi32>
    %c1_7 = arith.constant 1 : index
    %c0_8 = arith.constant 0 : index
    %8 = vector.load %arg3[%c1_7, %c0_8] : memref<2x2xi32, #tpu.memory_space<vmem>>, vector<1x2xi32>
    %9 = tpu.iota {dimensions = array<i32: 0>} : vector<8x2xi32>
    %10 = vector.broadcast %7 : vector<1x2xi32> to vector<8x2xi32>
    %11 = arith.cmpi sle, %9, %10 : vector<8x2xi32>
    %cst = arith.constant 1.000000e+00 : f32
    %12 = vector.broadcast %cst : f32 to vector<8x2xf32>
    %13 = arith.subf %4, %12 : vector<8x2xf32>
    %14 = arith.select %11, %13, %4 : vector<8x2xi1>, vector<8x2xf32>
    %15 = vector.broadcast %8 : vector<1x2xi32> to vector<8x2xi32>
    %16 = arith.cmpi sle, %9, %15 : vector<8x2xi32>
    %cst_9 = arith.constant 1.000000e+00 : f32
    %17 = vector.broadcast %cst_9 : f32 to vector<8x2xf32>
    %18 = arith.subf %6, %17 : vector<8x2xf32>
    %19 = arith.select %16, %18, %6 : vector<8x2xi1>, vector<8x2xf32>
    %20 = arith.mulf %14, %14 : vector<8x2xf32>
    %21 = vector.shape_cast %20 : vector<8x2xf32> to vector<1x8x2xf32>
    %cst_10 = arith.constant dense<0.000000e+00> : vector<1xf32>
    %22 = vector.multi_reduction <add>, %21, %cst_10 [1, 2] : vector<1x8x2xf32> to vector<1xf32>
    %23 = vector.shape_cast %22 : vector<1xf32> to vector<1x1x1xf32>
    %24 = vector.extract %23[0, 0, 0] : f32 from vector<1x1x1xf32>
    %25 = arith.mulf %19, %19 : vector<8x2xf32>
    %26 = vector.shape_cast %25 : vector<8x2xf32> to vector<1x8x2xf32>
    %cst_11 = arith.constant dense<0.000000e+00> : vector<1xf32>
    %27 = vector.multi_reduction <add>, %26, %cst_11 [1, 2] : vector<1x8x2xf32> to vector<1xf32>
    %28 = vector.shape_cast %27 : vector<1xf32> to vector<1x1x1xf32>
    %29 = vector.extract %28[0, 0, 0] : f32 from vector<1x1x1xf32>
    %c0_12 = arith.constant 0 : index
    %30 = memref.load %arg1[%c0_12] : memref<1xf32, #tpu.memory_space<smem>>
    %c0_13 = arith.constant 0 : index
    %31 = memref.load %arg4[%c0_13] : memref<1xf32, #tpu.memory_space<smem>>
    %32 = arith.mulf %30, %24 : f32
    %cst_14 = arith.constant 1.000000e+00 : f32
    %33 = arith.subf %cst_14, %30 : f32
    %34 = arith.mulf %33, %29 : f32
    %35 = arith.addf %32, %34 : f32
    %36 = arith.addf %31, %35 : f32
    %c0_15 = arith.constant 0 : index
    %37 = memref.load %arg4[%c0_15] : memref<1xf32, #tpu.memory_space<smem>>
    memref.store %36, %arg4[%c0_15] : memref<1xf32, #tpu.memory_space<smem>>
    return
  }
  func.func @transform_0(%arg0: i32) -> i32 {
    %c0_i32 = arith.constant 0 : i32
    %c0_i32_0 = arith.constant 0 : i32
    return %c0_i32 : i32
  }
  func.func @transform_1(%arg0: i32) -> (i32, i32, i32) {
    %c0_i32 = arith.constant 0 : i32
    %c0_i32_0 = arith.constant 0 : i32
    %c0_i32_1 = arith.constant 0 : i32
    return %c0_i32, %c0_i32_0, %arg0 : i32, i32, i32
  }
  func.func @transform_2(%arg0: i32) -> (i32, i32) {
    %c0_i32 = arith.constant 0 : i32
    %c0_i32_0 = arith.constant 0 : i32
    return %c0_i32, %arg0 : i32, i32
  }
  func.func @transform_3(%arg0: i32) -> i32 {
    %c0_i32 = arith.constant 0 : i32
    %c0_i32_0 = arith.constant 0 : i32
    return %c0_i32 : i32
  }
}

</mosaic_0001>

<bundles_post_ra>
// kernel: tpu_custom_call.1
= control target key start
LH: loop header
LB: loop body
LE: loop exit
PB: predicated region body
PF: predicated region fallthrough
CT: control target
= control target key end

     0   :  { %v27_v2 = vlaneseq  ;;  %s162_s0 = inlined_call_operand.<no memory space> [shape: f32[1], index: 0, kind: input, shape index: {}]   ;;  %s163_s1 = inlined_call_operand.vmem [shape: f32[2,8,2], index: 1, kind: input, shape index: {}]   ;;  %s164_s2 = inlined_call_operand.vmem [shape: s32[2,2], index: 2, kind: input, shape index: {}]   ;;  %s165_s3 = inlined_call_operand.hbm [shape: f32[1], index: 3, kind: output, shape index: {}]  }
   0x1   :  { %v22_v0 = vld [vmem:[%s163_s1] sm:$0xff]  ;;  %v88_v3 = vld [vmem:[%s163_s1 + $0x8] sm:$0xff] }
   0x2   :  { %v89_v1 = vld [vmem:[%s164_s2] ss:$0 sm:$0xff]  ;;  %v90_v4 = vadd.f32 -1.0, %v22_v0  ;;  %v91_v5 = vld [vmem:[%s164_s2 + $0x1] ss:$0 sm:$0xff]  ;;  %v92_v6 = vadd.f32 -1.0, %v88_v3 }
   0x3   :  { %9 = vsyncpa [#allocation4], 0  ;;  %v28_v7 = vshrl.u32 %v27_v2, 7  ;;  %vm44_vm2 = vcmask 15360   ;;  %s69_s21 = ssub.f32 1.0, %s162_s0  ;;  %s99_s30 = scalar_lea.hbm %s165_s3, 16 }
   0x4   :  { %p100_p0 = scmp.ne.s32.totalorder %s165_s3, %s99_s30  ;;  %p103_p1 = scmp.lt.u32.totalorder %s99_s30, %s165_s3 }
   0x5   :  { %vm33_vm0 = vcmp.le.s32.totalorder %v28_v7, %v89_v1  ;;  %vm40_vm1 = vcmp.le.s32.totalorder %v28_v7, %v91_v5 }
   0x6   :  { %v35_v8 = vsel %vm33_vm0, %v90_v4, %v22_v0  ;;  %v42_v9 = vsel %vm40_vm1, %v92_v6, %v88_v3  ;;  %p105_p2 = pnand %p103_p1, %p100_p0 }
   0x7   :  { %v43_v10 = vmul.f32 %v35_v8, %v35_v8  ;;  %v55_v11 = vmul.f32 %v42_v9, %v42_v9 }
   0x9   :  { %v45_v12 = vsel %vm44_vm2, %v43_v10, 0.0  ;;  %v56_v13 = vsel %vm44_vm2, %v55_v11, 0.0 }
   0xa   :  { %46 = vadd.xlane.f32.xlu0 %v45_v12 }
   0xe   :  { %57 = vadd.xlane.f32.xlu0 %v56_v13 }
  0x97   :  { %v47_v14 = vpop.xlane.xlu0 %46 }
  0x98   :  { %v48_v15 = vrot.slane %v47_v14, 4 }
  0x9a   :  { %v49_v16 = vadd.f32 %v48_v15, %v47_v14 }
  0x9b   :  { %v58_v17 = vpop.xlane.xlu0 %57 }
  0x9c   :  { %v50_v18 = vrot.slane %v49_v16, 2  ;;  %v59_v19 = vrot.slane %v58_v17, 4 }
  0x9e   :  { %v60_v20 = vadd.f32 %v59_v19, %v58_v17  ;;  %v51_v21 = vadd.f32 %v50_v18, %v49_v16 }
  0xa0   :  { %v61_v22 = vrot.slane %v60_v20, 2  ;;  %v52_v23 = vrot.slane %v51_v21, 1 }
  0xa2   :  { %v62_v24 = vadd.f32 %v61_v22, %v60_v20  ;;  %v53_v25 = vadd.f32 %v52_v23, %v51_v21 }
  0xa4   :  { %93 = vpush %v53_v25  ;;  %v63_v26 = vrot.slane %v62_v24, 1 }
  0xa6   :  { %v64_v27 = vadd.f32 %v63_v26, %v62_v24 }
  0xa8   :  { %95 = vpush %v64_v27 }
  0xd5   :  { %s94_s1 = spop %93 }
  0xd6   :  { %s68_s24 = smul.f32 %s94_s1, %s162_s0 }
  0xd9   :  { %s96_s25 = spop %95 }
  0xda   :  { %s70_s26 = smul.f32 %s96_s25, %s69_s21 }
  0xdc   :  { %s71_s27 = sadd.f32 %s70_s26, %s68_s24 }
  0xde   :  { %74 = sst [smem:[#allocation3]] %s71_s27 }
  0xdf   :  { %108 = shalt.err (!%p105_p2)
}
  0xe0   :  { %s111_s8 = smov [#allocation3]  }
  0xe1   :  { %82 = dma.smem_to_hbm %s111_s8, 16, %s165_s3, [#allocation4]  }
  0xe2   :  { %109 = dma.done.wait [#allocation4], 16  }
  0xe3   :  { %110 = vsyncadd [#allocation4], 4294967280 }
  0xe4   :  { %86 = sfence }
  0xe5   :  { %87 = vsyncpa [#allocation4], 1 }

</bundles_post_ra>
